<compile_context>
chip_gen: v5e
topology: v5e:2x2
jax: 0.10.0
libtpu: 0.0.40
codegen_flags: <defaults>
</compile_context>

<pallas_src>
import math

import jax
import jax.numpy as jnp
from jax.experimental import pallas as pl
from jax.experimental.pallas import tpu as pltpu


def _gcn_kernel(x_ref, att_ref, w_ref, b_ref, o_ref):
    # x_ref:   (B, N, Fin)   activation (any float dtype; cast in-kernel)
    # att_ref: (N, N)        graph adjacency/attention (compute dtype)
    # w_ref:   (Fin, Fout)   weight (compute dtype)
    # b_ref:   (1, Fout)     bias, f32
    # o_ref:   (B, N, Fout)  output, f32
    att = att_ref[...]
    w = w_ref[...]
    n, fout = att.shape[0], w.shape[1]

    # Hoist the bias broadcast out of the unrolled batch loop (no CSE of
    # broadcast_in_dim in JAX).
    bias = jnp.broadcast_to(b_ref[...], (n, fout))

    nb = x_ref.shape[0]  # static batch count -> statically unrolled loop
    for b in range(nb):
        xb = x_ref[b].astype(att.dtype)                             # (N, Fin)
        # Reassociated: (att @ x) @ W; both dots accumulate in f32 on the MXU.
        yb = jnp.dot(att, xb, preferred_element_type=jnp.float32)   # (N, Fin)
        ob = jnp.dot(yb.astype(w.dtype), w,
                     preferred_element_type=jnp.float32) + bias     # (N, Fout)
        o_ref[b] = ob.astype(o_ref.dtype)


def prepare_gcn_params(weight, att, bias, *, compute_dtype=jnp.float32):
    """One-time parameter prep, hoisted out of the per-call hot path.

    Casting (e.g. to bf16 for MXU-native matmuls) and the bias reshape happen
    here, once at init, so graph_convolution() issues exactly one XLA op per
    forward.  Returns (att, weight, bias2d) ready for graph_convolution().
    """
    out_features = weight.shape[1]
    a = jnp.asarray(att, dtype=compute_dtype)
    w = jnp.asarray(weight, dtype=compute_dtype)
    if bias is None:
        b = jnp.zeros((1, out_features), jnp.float32)
    else:
        b = jnp.asarray(bias, dtype=jnp.float32).reshape(1, out_features)
    return a, w, b


@jax.jit
def graph_convolution(x, att, weight, bias2d):
    """x: (B, N, Fin); att: (N, N); weight: (Fin, Fout); bias2d: (1, Fout)."""
    B, N, Fin = x.shape
    Fout = weight.shape[1]

    # Real (unpadded) cost for XLA's scheduler around the custom call.
    flops = 2 * B * N * N * Fin + 2 * B * N * Fin * Fout
    bytes_accessed = (
        x.size * x.dtype.itemsize
        + att.size * att.dtype.itemsize
        + weight.size * weight.dtype.itemsize
        + bias2d.size * bias2d.dtype.itemsize
        + B * N * Fout * 4
    )

    vmem = lambda: pl.BlockSpec(memory_space=pltpu.MemorySpace.VMEM)
    return pl.pallas_call(
        _gcn_kernel,
        out_shape=jax.ShapeDtypeStruct((B, N, Fout), jnp.float32),
        in_specs=[vmem(), vmem(), vmem(), vmem()],
        out_specs=vmem(),
        cost_estimate=pl.CostEstimate(
            flops=flops, transcendentals=0, bytes_accessed=bytes_accessed
        ),
    )(x, att, weight, bias2d)


if __name__ == "__main__":
    # Module config consistent with GraphConvolution(in, out, node_n=48).
    in_features, out_features, node_n, batch = 32, 32, 48, 2

    key = jax.random.PRNGKey(0)
    kx, kw, ka, kb = jax.random.split(key, 4)

    # Deterministic init mirroring reset_parameters(): U(-stdv, stdv),
    # stdv = 1/sqrt(out_features).
    stdv = 1.0 / math.sqrt(out_features)
    weight = jax.random.uniform(kw, (in_features, out_features),
                                minval=-stdv, maxval=stdv, dtype=jnp.float32)
    att = jax.random.uniform(ka, (node_n, node_n),
                             minval=-stdv, maxval=stdv, dtype=jnp.float32)
    bias = jax.random.uniform(kb, (out_features,),
                              minval=-stdv, maxval=stdv, dtype=jnp.float32)
    x = jax.random.normal(kx, (batch, node_n, in_features), dtype=jnp.float32)

    # ---- f32 path (default; matches the PyTorch FloatTensor module) ----
    att_p, w_p, b_p = prepare_gcn_params(weight, att, bias,
                                         compute_dtype=jnp.float32)
    out = jax.block_until_ready(graph_convolution(x, att_p, w_p, b_p))
    assert out.shape == (batch, node_n, out_features)

    # References: the module's literal order att @ (x @ W) + b, and the
    # mathematically identical reassociated order the kernel uses.
    ref_literal = jnp.matmul(att, jnp.matmul(x, weight)) + bias
    ref_reassoc = jnp.matmul(jnp.matmul(att, x), weight) + bias
    assert jnp.allclose(out, ref_reassoc, atol=1e-4, rtol=1e-4), \
        "f32 kernel mismatch vs reference"
    assert jnp.allclose(out, ref_literal, atol=5e-2, rtol=5e-2), \
        "f32 kernel mismatch vs literal-order reference"

    # ---- bf16-operand path (MXU-native inputs, f32 accumulation) ----
    att_h, w_h, b_h = prepare_gcn_params(weight, att, bias,
                                         compute_dtype=jnp.bfloat16)
    out_h = jax.block_until_ready(graph_convolution(x, att_h, w_h, b_h))
    assert out_h.shape == (batch, node_n, out_features)
    assert jnp.allclose(out_h, ref_reassoc, atol=1e-1, rtol=1e-1), \
        "bf16 kernel mismatch vs reference"

    print("KERNEL_OK")
</pallas_src>

<mosaic_0001>
module attributes {stable_mosaic.version = 11 : i64} {
  func.func @_gcn_kernel(%arg0: memref<2x48x32xf32, #tpu.memory_space<vmem>>, %arg1: memref<48x48xf32, #tpu.memory_space<vmem>>, %arg2: memref<32x32xf32, #tpu.memory_space<vmem>>, %arg3: memref<1x32xf32, #tpu.memory_space<vmem>>, %arg4: memref<2x48x32xf32, #tpu.memory_space<vmem>>) attributes {dimension_semantics = [], scalar_prefetch = 0 : i64, scratch_operands = 0 : i64, tpu.core_type = #tpu.core_type<tc>} {
    %c0 = arith.constant 0 : index
    %c0_0 = arith.constant 0 : index
    %0 = vector.load %arg1[%c0, %c0_0] : memref<48x48xf32, #tpu.memory_space<vmem>>, vector<48x48xf32>
    %c0_1 = arith.constant 0 : index
    %c0_2 = arith.constant 0 : index
    %1 = vector.load %arg2[%c0_1, %c0_2] : memref<32x32xf32, #tpu.memory_space<vmem>>, vector<32x32xf32>
    %c0_3 = arith.constant 0 : index
    %c0_4 = arith.constant 0 : index
    %2 = vector.load %arg3[%c0_3, %c0_4] : memref<1x32xf32, #tpu.memory_space<vmem>>, vector<1x32xf32>
    %3 = vector.shape_cast %2 : vector<1x32xf32> to vector<1x32xf32>
    %4 = vector.broadcast %3 : vector<1x32xf32> to vector<48x32xf32>
    %c0_5 = arith.constant 0 : index
    %c0_6 = arith.constant 0 : index
    %c0_7 = arith.constant 0 : index
    %5 = vector.load %arg0[%c0_5, %c0_6, %c0_7] : memref<2x48x32xf32, #tpu.memory_space<vmem>>, vector<1x48x32xf32>
    %6 = vector.shape_cast %5 : vector<1x48x32xf32> to vector<48x32xf32>
    %cst = arith.constant dense<0.000000e+00> : vector<48x32xf32>
    %7 = tpu.matmul %0, %6, %cst {dimension_numbers = #tpu.dot_dimension_numbers<[1], [0], [0], [1], [0, 0, 1, 1], [], []>} : vector<48x48xf32>, vector<48x32xf32>, vector<48x32xf32> -> vector<48x32xf32>
    %cst_8 = arith.constant dense<0.000000e+00> : vector<48x32xf32>
    %8 = tpu.matmul %7, %1, %cst_8 {dimension_numbers = #tpu.dot_dimension_numbers<[1], [0], [0], [1], [0, 0, 1, 1], [], []>} : vector<48x32xf32>, vector<32x32xf32>, vector<48x32xf32> -> vector<48x32xf32>
    %9 = arith.addf %8, %4 : vector<48x32xf32>
    %c0_9 = arith.constant 0 : index
    %c0_10 = arith.constant 0 : index
    %c0_11 = arith.constant 0 : index
    %10 = vector.load %arg4[%c0_9, %c0_10, %c0_11] : memref<2x48x32xf32, #tpu.memory_space<vmem>>, vector<1x48x32xf32>
    %11 = vector.shape_cast %10 : vector<1x48x32xf32> to vector<48x32xf32>
    %12 = vector.shape_cast %9 : vector<48x32xf32> to vector<1x48x32xf32>
    tpu.vector_store %arg4[%c0_9, %c0_10, %c0_11], %12 {strides = array<i32>} : memref<2x48x32xf32, #tpu.memory_space<vmem>>, vector<1x48x32xf32>,
    %c1 = arith.constant 1 : index
    %c0_12 = arith.constant 0 : index
    %c0_13 = arith.constant 0 : index
    %13 = vector.load %arg0[%c1, %c0_12, %c0_13] : memref<2x48x32xf32, #tpu.memory_space<vmem>>, vector<1x48x32xf32>
    %14 = vector.shape_cast %13 : vector<1x48x32xf32> to vector<48x32xf32>
    %cst_14 = arith.constant dense<0.000000e+00> : vector<48x32xf32>
    %15 = tpu.matmul %0, %14, %cst_14 {dimension_numbers = #tpu.dot_dimension_numbers<[1], [0], [0], [1], [0, 0, 1, 1], [], []>} : vector<48x48xf32>, vector<48x32xf32>, vector<48x32xf32> -> vector<48x32xf32>
    %cst_15 = arith.constant dense<0.000000e+00> : vector<48x32xf32>
    %16 = tpu.matmul %15, %1, %cst_15 {dimension_numbers = #tpu.dot_dimension_numbers<[1], [0], [0], [1], [0, 0, 1, 1], [], []>} : vector<48x32xf32>, vector<32x32xf32>, vector<48x32xf32> -> vector<48x32xf32>
    %17 = arith.addf %16, %4 : vector<48x32xf32>
    %c1_16 = arith.constant 1 : index
    %c0_17 = arith.constant 0 : index
    %c0_18 = arith.constant 0 : index
    %18 = vector.load %arg4[%c1_16, %c0_17, %c0_18] : memref<2x48x32xf32, #tpu.memory_space<vmem>>, vector<1x48x32xf32>
    %19 = vector.shape_cast %18 : vector<1x48x32xf32> to vector<48x32xf32>
    %20 = vector.shape_cast %17 : vector<48x32xf32> to vector<1x48x32xf32>
    tpu.vector_store %arg4[%c1_16, %c0_17, %c0_18], %20 {strides = array<i32>} : memref<2x48x32xf32, #tpu.memory_space<vmem>>, vector<1x48x32xf32>,
    return
  }
}

</mosaic_0001>

<bundles_post_ra>
// kernel: graph_convolution.1
= control target key start
LH: loop header
LB: loop body
LE: loop exit
PB: predicated region body
PF: predicated region fallthrough
CT: control target
= control target key end

     0   :  { %vm37_vm0 = vcmask 392192   ;;  %vm91_vm1 = vcmask 261120   ;;  %s460_s0 = inlined_call_operand.vmem [shape: f32[2,48,32], index: 0, kind: input, shape index: {}]   ;;  %s461_s1 = inlined_call_operand.vmem [shape: f32[48,48], index: 1, kind: input, shape index: {}]   ;;  %s462_s2 = inlined_call_operand.vmem [shape: f32[32,32], index: 2, kind: input, shape index: {}]   ;;  %s463_s3 = inlined_call_operand.vmem [shape: f32[1,32], index: 3, kind: input, shape index: {}]   ;;  %s464_s4 = inlined_call_operand.vmem [shape: f32[2,48,32], index: 4, kind: output, shape index: {}]  }
   0x1   :  { %v274_v0 = vld [vmem:[%s460_s0 + $0x58] sm:$0xff]  ;;  %v273_v1 = vld [vmem:[%s460_s0 + $0x50] sm:$0xff]  ;;  %v272_v2 = vld [vmem:[%s460_s0 + $0x48] sm:$0xff] }
   0x2   :  { %168 = vmatpush.msra.mxu2 %v274_v0  ;;  %v36_v3 = vld [vmem:[%s460_s0 + $0x28] sm:$0xff]  ;;  %v35_v4 = vld [vmem:[%s460_s0 + $0x20] sm:$0xff]  ;;  %v34_v6 = vld [vmem:[%s460_s0 + $0x18] sm:$0xff] }
   0x3   :  { %66 = vmatpush.msra.mxu0 %v36_v3  ;;  %v271_v5 = vld [vmem:[%s460_s0 + $0x40] sm:$0xff]  ;;  %v270_v7 = vld [vmem:[%s460_s0 + $0x38] sm:$0xff]  ;;  %v33_v8 = vld [vmem:[%s460_s0 + $0x10] sm:$0xff] }
   0x4   :  { %169 = vmatpush.msra.mxu2 %v273_v1  ;;  %v269_v9 = vld [vmem:[%s460_s0 + $0x30] sm:$0xff]  ;;  %v32_v10 = vld [vmem:[%s460_s0 + $0x8] sm:$0xff]  ;;  %v17_v11 = vld [vmem:[%s461_s1] sm:$0xff] }
   0x5   :  { %67 = vmatpush.msra.mxu0 %v35_v4  ;;  %v31_v12 = vld [vmem:[%s460_s0] sm:$0xff]  ;;  %v18_v13 = vld [vmem:[%s461_s1 + $0x8] sm:$0xff]  ;;  %v26_v14 = vld [vmem:[%s462_s2 + $0x18] sm:$0xff] }
   0x6   :  { %170 = vmatpush.msra.mxu2 %v272_v2  ;;  %v25_v15 = vld [vmem:[%s462_s2 + $0x10] sm:$0xff]  ;;  %223 = vmatpush.msra.mxu3 %v26_v14  ;;  %v24_v16 = vld [vmem:[%s462_s2 + $0x8] sm:$0xff]  ;;  %v20_v18 = vld [vmem:[%s461_s1 + $0x18] sm:$0xff] }
   0x7   :  { %68 = vmatpush.msra.mxu0 %v34_v6  ;;  %122 = vmatpush.msra.mxu1 %v26_v14  ;;  %v19_v17 = vld [vmem:[%s461_s1 + $0x10] sm:$0xff]  ;;  %v21_v19 = vld [vmem:[%s461_s1 + $0x20] sm:$0xff]  ;;  %v22_v20 = vld [vmem:[%s461_s1 + $0x28] sm:$0xff] }
   0x8   :  { %171 = vmatpush.msra.mxu2 %v271_v5  ;;  %224 = vmatpush.msra.mxu3 %v25_v15  ;;  %v23_v21 = vld [vmem:[%s462_s2] sm:$0xff] }
   0x9   :  { %69 = vmatpush.msra.mxu0 %v33_v8  ;;  %123 = vmatpush.msra.mxu1 %v25_v15  ;;  %v293_v34 = vld [vmem:[%s463_s3] ss:$0 sm:$0xff] }
   0xa   :  { %172 = vmatpush.msra.mxu2 %v270_v7  ;;  %225 = vmatpush.msra.mxu3 %v24_v16 }
   0xb   :  { %70 = vmatpush.msra.mxu0 %v32_v10  ;;  %124 = vmatpush.msra.mxu1 %v24_v16 }
   0xc   :  { %173 = vmatpush.msra.mxu2 %v269_v9  ;;  %226 = vmatpush.msra.mxu3 %v23_v21 }
   0xd   :  { %275 = vmatmul.msk.f32.vlgmr.msra.gmra.mxu2 %vm37_vm0, %v17_v11  ;;  %71 = vmatpush.msra.mxu0 %v31_v12 }
   0xe   :  { %257 = vmatmul.msk.f32.vlgmr.msra.gmra.mxu0 %vm37_vm0, %v17_v11  ;;  %125 = vmatpush.msra.mxu1 %v23_v21 }
  0x15   :  { %276 = vmatmul.msk.f32.gmra.mxu2 %vm37_vm0, %v18_v13 }
  0x16   :  { %258 = vmatmul.msk.f32.gmra.mxu0 %vm37_vm0, %v18_v13 }
  0x1d   :  { %277 = vmatmul.msk.f32.gmra.mxu2 %vm37_vm0, %v19_v17 }
  0x1e   :  { %259 = vmatmul.msk.f32.gmra.mxu0 %vm37_vm0, %v19_v17 }
  0x25   :  { %278 = vmatmul.msk.f32.gmra.mxu2 %vm37_vm0, %v20_v18 }
  0x26   :  { %260 = vmatmul.msk.f32.gmra.mxu0 %vm37_vm0, %v20_v18 }
  0x2d   :  { %279 = vmatmul.msk.f32.gmra.mxu2 %vm37_vm0, %v21_v19 }
  0x2e   :  { %261 = vmatmul.msk.f32.gmra.mxu0 %vm37_vm0, %v21_v19 }
  0x35   :  { %280 = vmatmul.msk.f32.gmra.mxu2 %vm37_vm0, %v22_v20 }
  0x36   :  { %262 = vmatmul.msk.f32.gmra.mxu0 %vm37_vm0, %v22_v20 }
  0x8b   :  { %v73_v22 = vpop.f32.mrf.mxu0 }
  0x8c   :  { %263 = vmatmul.msk.f32.vlgmr.msra.gmra.mxu1 %vm91_vm1, %v73_v22 }
  0x90   :  { %v175_v23 = vpop.f32.mrf.mxu2 }
  0x91   :  { %281 = vmatmul.msk.f32.vlgmr.msra.gmra.mxu3 %vm91_vm1, %v175_v23 }
  0x93   :  { %v76_v24 = vpop.f32.mrf.mxu0 }
  0x94   :  { %264 = vmatmul.msk.f32.gmra.mxu1 %vm91_vm1, %v76_v24 }
  0x98   :  { %v178_v25 = vpop.f32.mrf.mxu2 }
  0x99   :  { %282 = vmatmul.msk.f32.gmra.mxu3 %vm91_vm1, %v178_v25 }
  0x9b   :  { %v79_v26 = vpop.f32.mrf.mxu0 }
  0x9c   :  { %265 = vmatmul.msk.f32.gmra.mxu1 %vm91_vm1, %v79_v26 }
  0xa0   :  { %v181_v27 = vpop.f32.mrf.mxu2 }
  0xa1   :  { %283 = vmatmul.msk.f32.gmra.mxu3 %vm91_vm1, %v181_v27 }
  0xa3   :  { %v82_v28 = vpop.f32.mrf.mxu0 }
  0xa4   :  { %266 = vmatmul.msk.f32.gmra.mxu1 %vm91_vm1, %v82_v28 }
  0xa8   :  { %v184_v29 = vpop.f32.mrf.mxu2 }
  0xa9   :  { %284 = vmatmul.msk.f32.gmra.mxu3 %vm91_vm1, %v184_v29 }
  0xab   :  { %v85_v30 = vpop.f32.mrf.mxu0 }
  0xac   :  { %267 = vmatmul.msk.f32.gmra.mxu1 %vm91_vm1, %v85_v30 }
  0xb0   :  { %v187_v31 = vpop.f32.mrf.mxu2 }
  0xb1   :  { %285 = vmatmul.msk.f32.gmra.mxu3 %vm91_vm1, %v187_v31 }
  0xb3   :  { %v88_v32 = vpop.f32.mrf.mxu0 }
  0xb4   :  { %268 = vmatmul.msk.f32.gmra.mxu1 %vm91_vm1, %v88_v32 }
  0xb8   :  { %v190_v33 = vpop.f32.mrf.mxu2 }
  0xb9   :  { %286 = vmatmul.msk.f32.gmra.mxu3 %vm91_vm1, %v190_v33 }
 0x109   :  { %v127_v35 = vpop.f32.mrf.mxu1 }
 0x10a   :  { %v128_v36 = vadd.f32 %v293_v34, %v127_v35 }
 0x10c   :  { %145 = vst.msk [vmem:[%s464_s4] sm:$0xff] %vm91_vm1, %v128_v36 }
 0x111   :  { %v130_v37 = vpop.f32.mrf.mxu1 }
 0x112   :  { %v131_v38 = vadd.f32 %v293_v34, %v130_v37 }
 0x114   :  { %v228_v39 = vpop.f32.mrf.mxu3  ;;  %146 = vst.msk [vmem:[%s464_s4 + $0x8] sm:$0xff] %vm91_vm1, %v131_v38 }
 0x115   :  { %v229_v40 = vadd.f32 %v293_v34, %v228_v39 }
 0x117   :  { %287 = vst.msk [vmem:[%s464_s4 + $0x30] sm:$0xff] %vm91_vm1, %v229_v40 }
 0x119   :  { %v133_v41 = vpop.f32.mrf.mxu1 }
 0x11a   :  { %v134_v42 = vadd.f32 %v293_v34, %v133_v41 }
 0x11c   :  { %v231_v43 = vpop.f32.mrf.mxu3  ;;  %147 = vst.msk [vmem:[%s464_s4 + $0x10] sm:$0xff] %vm91_vm1, %v134_v42 }
 0x11d   :  { %v232_v44 = vadd.f32 %v293_v34, %v231_v43 }
 0x11f   :  { %288 = vst.msk [vmem:[%s464_s4 + $0x38] sm:$0xff] %vm91_vm1, %v232_v44 }
 0x121   :  { %v136_v45 = vpop.f32.mrf.mxu1 }
 0x122   :  { %v137_v46 = vadd.f32 %v293_v34, %v136_v45 }
 0x124   :  { %v234_v47 = vpop.f32.mrf.mxu3  ;;  %148 = vst.msk [vmem:[%s464_s4 + $0x18] sm:$0xff] %vm91_vm1, %v137_v46 }
 0x125   :  { %v235_v48 = vadd.f32 %v293_v34, %v234_v47 }
 0x127   :  { %289 = vst.msk [vmem:[%s464_s4 + $0x40] sm:$0xff] %vm91_vm1, %v235_v48 }
 0x129   :  { %v139_v49 = vpop.f32.mrf.mxu1 }
 0x12a   :  { %v140_v50 = vadd.f32 %v293_v34, %v139_v49 }
 0x12c   :  { %v237_v51 = vpop.f32.mrf.mxu3  ;;  %149 = vst.msk [vmem:[%s464_s4 + $0x20] sm:$0xff] %vm91_vm1, %v140_v50 }
 0x12d   :  { %v238_v52 = vadd.f32 %v293_v34, %v237_v51 }
 0x12f   :  { %290 = vst.msk [vmem:[%s464_s4 + $0x48] sm:$0xff] %vm91_vm1, %v238_v52 }
 0x131   :  { %v142_v53 = vpop.f32.mrf.mxu1 }
 0x132   :  { %v143_v54 = vadd.f32 %v293_v34, %v142_v53 }
 0x134   :  { %v240_v55 = vpop.f32.mrf.mxu3  ;;  %150 = vst.msk [vmem:[%s464_s4 + $0x28] sm:$0xff] %vm91_vm1, %v143_v54 }
 0x135   :  { %v241_v56 = vadd.f32 %v293_v34, %v240_v55 }
 0x137   :  { %291 = vst.msk [vmem:[%s464_s4 + $0x50] sm:$0xff] %vm91_vm1, %v241_v56 }
 0x13c   :  { %v243_v57 = vpop.f32.mrf.mxu3 }
 0x13d   :  { %v244_v58 = vadd.f32 %v293_v34, %v243_v57 }
 0x13f   :  { %292 = vst.msk [vmem:[%s464_s4 + $0x58] sm:$0xff] %vm91_vm1, %v244_v58 }

</bundles_post_ra>
